<compile_context>
chip_gen: v6e
topology: v6e:2x2x1
jax: 0.10.0
libtpu: 0.0.40
codegen_flags: <defaults>
</compile_context>

<pallas_src>
import functools

import jax
import jax.numpy as jnp
import numpy as np
from jax.experimental import pallas as pl
from jax.experimental.pallas import tpu as pltpu


def _bilinear_matrix(n_in: int, n_out: int) -> np.ndarray:
    """(n_out, n_in) row-stochastic matrix for 1-D bilinear resize with
    align_corners=True (matches torch.nn.UpsamplingBilinear2d)."""
    if n_out == 1:
        src = np.zeros((1,), dtype=np.float64)
    else:
        src = np.arange(n_out, dtype=np.float64) * (n_in - 1) / (n_out - 1)
    low = np.clip(np.floor(src).astype(np.int64), 0, n_in - 1)
    high = np.minimum(low + 1, n_in - 1)
    frac = (src - low).astype(np.float32)
    m = np.zeros((n_out, n_in), dtype=np.float32)
    rows = np.arange(n_out)
    np.add.at(m, (rows, low), 1.0 - frac)
    np.add.at(m, (rows, high), frac)
    return m


def _pick_spatial_tile(p_total: int) -> int:
    """Lane-dense output-spatial tile: multiple of 128 dividing Hout*Wout
    (or the full extent when it is small / indivisible)."""
    if p_total <= 2048:
        return p_total
    for t in (2048, 1024, 512, 256, 128):
        if p_total % t == 0:
            return t
    return p_total


def _conv_first_kernel(x_ref, ut_ref, w_ref, b_ref, o_ref, cc_ref):
    # x_ref : (1, Cin, H*W)      bf16   channels-first, space flattened
    # ut_ref: (H*W, TILE_P)      bf16   transposed bilinear operator, spatial tile
    # w_ref : (Cout, Cin)        bf16   1x1 conv weight
    # b_ref : (Cout, 1)          f32    conv bias
    # o_ref : (1, Cout, TILE_P)  f32    lane-dense output tile
    # cc_ref: (Cout, H*W)        bf16   VMEM cache of the conv output
    #
    # The channel-mixing matmul does not depend on the spatial tile index:
    # compute it once per batch element (pi == 0) and reuse it for every
    # spatial output tile of that element.
    @pl.when(pl.program_id(1) == 0)
    def _():
        xc = jnp.dot(w_ref[...], x_ref[0], preferred_element_type=jnp.float32)
        cc_ref[...] = xc.astype(cc_ref.dtype)

    y = jnp.dot(cc_ref[...], ut_ref[...], preferred_element_type=jnp.float32)
    o_ref[0] = (y + b_ref[...]).astype(o_ref.dtype)


def _upsample_first_kernel(x_ref, ut_ref, w_ref, b_ref, o_ref):
    # Cin < Cout: upsample first (smaller M for the big matmul), conv after.
    up = jnp.dot(x_ref[0], ut_ref[...], preferred_element_type=jnp.float32)
    y = jnp.dot(w_ref[...], up.astype(jnp.bfloat16),
                preferred_element_type=jnp.float32)
    o_ref[0] = (y + b_ref[...]).astype(o_ref.dtype)


def segformer_decoder_block(x_nchw, weight, bias, scale_factor: int):
    """One SegFormerDecoderBlock: bilinear upsample (align_corners) + 1x1 conv.

    x_nchw: (B, Cin, H, W) float32
    weight: (Cout, Cin, 1, 1) float32   (PyTorch Conv2d layout)
    bias:   (Cout,) float32
    returns (B, Cout, H*scale, W*scale) float32
    """
    B, Cin, H, W = x_nchw.shape
    Cout = weight.shape[0]
    Hout, Wout = H * scale_factor, W * scale_factor
    HW, P = H * W, Hout * Wout

    # Free row-major reshapes only (no HBM transposes); bf16 operands for MXU.
    x = x_nchw.reshape(B, Cin, HW).astype(jnp.bfloat16)
    ut = np.kron(_bilinear_matrix(H, Hout), _bilinear_matrix(W, Wout)).T   # (HW, P)
    ut = jnp.asarray(ut, dtype=jnp.bfloat16)
    w = jnp.asarray(weight).reshape(Cout, Cin).astype(jnp.bfloat16)
    b = jnp.asarray(bias).reshape(Cout, 1).astype(jnp.float32)

    conv_first = Cout <= Cin
    tile_p = _pick_spatial_tile(P)
    n_p = P // tile_p

    if conv_first:
        kernel = _conv_first_kernel
        scratch_shapes = [pltpu.VMEM((Cout, HW), jnp.bfloat16)]
        # Spatial tiles of one batch element reuse the cached conv result.
        dim_sem = ("parallel", "arbitrary")
    else:
        kernel = _upsample_first_kernel
        scratch_shapes = []
        dim_sem = ("parallel", "parallel")

    out = pl.pallas_call(
        kernel,
        out_shape=jax.ShapeDtypeStruct((B, Cout, P), jnp.float32),
        grid=(B, n_p),
        in_specs=[
            pl.BlockSpec((1, Cin, HW), lambda bi, pi: (bi, 0, 0)),
            pl.BlockSpec((HW, tile_p), lambda bi, pi: (0, pi)),
            pl.BlockSpec((Cout, Cin), lambda bi, pi: (0, 0)),
            pl.BlockSpec((Cout, 1), lambda bi, pi: (0, 0)),
        ],
        out_specs=pl.BlockSpec((1, Cout, tile_p), lambda bi, pi: (bi, 0, pi)),
        scratch_shapes=scratch_shapes,
        compiler_params=pltpu.CompilerParams(
            dimension_semantics=dim_sem,
            vmem_limit_bytes=64 * 1024 * 1024),
    )(x, ut, w, b)

    # Free reshape back to NCHW.
    return out.reshape(B, Cout, Hout, Wout)


def segformer_decoder(features, params, scale_factors):
    """SegFormerDecoder.forward: list of features -> list of decoded features."""
    outs = []
    for feat, (w, b), s in zip(features, params, scale_factors):
        outs.append(segformer_decoder_block(feat, w, b, s))
    return outs


def _reference_block(x_nchw, weight, bias, scale_factor):
    # Pure-JAX f32 reference built from the same linear operators.
    B, Cin, H, W = x_nchw.shape
    Cout = weight.shape[0]
    Hout, Wout = H * scale_factor, W * scale_factor
    u = jnp.asarray(np.kron(_bilinear_matrix(H, Hout), _bilinear_matrix(W, Wout)))
    xf = x_nchw.reshape(B, Cin, H * W)
    up = jnp.einsum("ps,bcs->bcp", u, xf)                               # upsample
    y = jnp.einsum("oc,bcp->bop", weight.reshape(Cout, Cin), up)        # 1x1 conv
    y = y + bias.reshape(1, Cout, 1)
    return y.reshape(B, Cout, Hout, Wout)


if __name__ == "__main__":
    key = jax.random.PRNGKey(0)

    out_channels = 8
    widths = [16, 8, 4]          # channels of the multi-scale encoder features
    spatial = [4, 8, 16]         # spatial size of each feature map
    scale_factors = [4, 2, 1]    # each stage upsamples to 16x16
    batch = 2

    keys = jax.random.split(key, 3 * len(widths))
    features, params = [], []
    ki = 0
    for cin, hw in zip(widths, spatial):
        features.append(
            jax.random.normal(keys[ki], (batch, cin, hw, hw), dtype=jnp.float32))
        ki += 1
    for cin in widths:
        w = 0.1 * jax.random.normal(keys[ki], (out_channels, cin, 1, 1), jnp.float32)
        ki += 1
        b = 0.1 * jax.random.normal(keys[ki], (out_channels,), jnp.float32)
        ki += 1
        params.append((w, b))

    outs = segformer_decoder(features, params, scale_factors)
    outs = jax.block_until_ready(outs)

    # Sanity check against a pure-JAX f32 composition of the same linear maps
    # (kernel runs bf16 on the MXU -> relaxed tolerances).
    for feat, (w, b), s, o in zip(features, params, scale_factors, outs):
        ref = _reference_block(feat, w, b, s)
        assert o.shape == ref.shape
        np.testing.assert_allclose(np.asarray(o), np.asarray(ref),
                                   rtol=3e-2, atol=3e-2)

    print("KERNEL_OK")
</pallas_src>

<mosaic_0001>
module attributes {stable_mosaic.version = 11 : i64} {
  func.func @_conv_first_kernel(%arg0: i32, %arg1: i32, %arg2: memref<1x16x16xbf16, #tpu.memory_space<vmem>>, %arg3: memref<16x256xbf16, #tpu.memory_space<vmem>>, %arg4: memref<8x16xbf16, #tpu.memory_space<vmem>>, %arg5: memref<8x1xf32, #tpu.memory_space<vmem>>, %arg6: memref<1x8x256xf32, #tpu.memory_space<vmem>>, %arg7: memref<8x16xbf16, #tpu.memory_space<vmem>>) attributes {dimension_semantics = [#tpu.dimension_semantics<parallel>, #tpu.dimension_semantics<arbitrary>], iteration_bounds = array<i64: 2, 1>, scalar_prefetch = 0 : i64, scratch_operands = 1 : i64, tpu.core_type = #tpu.core_type<tc>, window_params = [{transform_indices = @transform_0, window_bounds = array<i64: 1, 16, 16>}, {transform_indices = @transform_1, window_bounds = array<i64: 16, 256>}, {pipeline_mode = #tpu.pipeline_mode<synchronous>, transform_indices = @transform_2, window_bounds = array<i64: 8, 16>}, {pipeline_mode = #tpu.pipeline_mode<synchronous>, transform_indices = @transform_3, window_bounds = array<i64: 8, 1>}, {transform_indices = @transform_4, window_bounds = array<i64: 1, 8, 256>}]} {
    %c0_i32 = arith.constant 0 : i32
    %0 = arith.cmpi eq, %arg1, %c0_i32 : i32
    %1 = arith.extui %0 : i1 to i32
    %c0_i32_0 = arith.constant 0 : i32
    %2 = arith.cmpi ne, %1, %c0_i32_0 : i32
    scf.if %2 {
      %c0_9 = arith.constant 0 : index
      %c0_10 = arith.constant 0 : index
      %12 = vector.load %arg4[%c0_9, %c0_10] : memref<8x16xbf16, #tpu.memory_space<vmem>>, vector<8x16xbf16>
      %c0_11 = arith.constant 0 : index
      %c0_12 = arith.constant 0 : index
      %c0_13 = arith.constant 0 : index
      %13 = vector.load %arg2[%c0_11, %c0_12, %c0_13] : memref<1x16x16xbf16, #tpu.memory_space<vmem>>, vector<1x16x16xbf16>
      %14 = vector.shape_cast %13 : vector<1x16x16xbf16> to vector<16x16xbf16>
      %cst_14 = arith.constant dense<0.000000e+00> : vector<8x16xf32>
      %15 = tpu.matmul %12, %14, %cst_14 {dimension_numbers = #tpu.dot_dimension_numbers<[1], [0], [0], [1], [0, 0, 1, 1], [], []>} : vector<8x16xbf16>, vector<16x16xbf16>, vector<8x16xf32> -> vector<8x16xf32>
      %16 = arith.truncf %15 : vector<8x16xf32> to vector<8x16xbf16>
      %c0_15 = arith.constant 0 : index
      %c0_16 = arith.constant 0 : index
      %17 = vector.load %arg7[%c0_15, %c0_16] : memref<8x16xbf16, #tpu.memory_space<vmem>>, vector<8x16xbf16>
      tpu.vector_store %arg7[%c0_15, %c0_16], %16 {strides = array<i32>} : memref<8x16xbf16, #tpu.memory_space<vmem>>, vector<8x16xbf16>,
    } else {
    }
    %c0 = arith.constant 0 : index
    %c0_1 = arith.constant 0 : index
    %3 = vector.load %arg7[%c0, %c0_1] : memref<8x16xbf16, #tpu.memory_space<vmem>>, vector<8x16xbf16>
    %c0_2 = arith.constant 0 : index
    %c0_3 = arith.constant 0 : index
    %4 = vector.load %arg3[%c0_2, %c0_3] : memref<16x256xbf16, #tpu.memory_space<vmem>>, vector<16x256xbf16>
    %cst = arith.constant dense<0.000000e+00> : vector<8x256xf32>
    %5 = tpu.matmul %3, %4, %cst {dimension_numbers = #tpu.dot_dimension_numbers<[1], [0], [0], [1], [0, 0, 1, 1], [], []>} : vector<8x16xbf16>, vector<16x256xbf16>, vector<8x256xf32> -> vector<8x256xf32>
    %c0_4 = arith.constant 0 : index
    %c0_5 = arith.constant 0 : index
    %6 = vector.load %arg5[%c0_4, %c0_5] : memref<8x1xf32, #tpu.memory_space<vmem>>, vector<8x1xf32>
    %7 = vector.broadcast %6 : vector<8x1xf32> to vector<8x256xf32>
    %8 = arith.addf %5, %7 : vector<8x256xf32>
    %c0_6 = arith.constant 0 : index
    %c0_7 = arith.constant 0 : index
    %c0_8 = arith.constant 0 : index
    %9 = vector.load %arg6[%c0_6, %c0_7, %c0_8] : memref<1x8x256xf32, #tpu.memory_space<vmem>>, vector<1x8x256xf32>
    %10 = vector.shape_cast %9 : vector<1x8x256xf32> to vector<8x256xf32>
    %11 = vector.shape_cast %8 : vector<8x256xf32> to vector<1x8x256xf32>
    tpu.vector_store %arg6[%c0_6, %c0_7, %c0_8], %11 {strides = array<i32>} : memref<1x8x256xf32, #tpu.memory_space<vmem>>, vector<1x8x256xf32>,
    return
  }
  func.func @transform_0(%arg0: i32, %arg1: i32) -> (i32, i32, i32) {
    %c0_i32 = arith.constant 0 : i32
    %c0_i32_0 = arith.constant 0 : i32
    %c0_i32_1 = arith.constant 0 : i32
    return %arg0, %c0_i32, %c0_i32_0 : i32, i32, i32
  }
  func.func @transform_1(%arg0: i32, %arg1: i32) -> (i32, i32) {
    %c0_i32 = arith.constant 0 : i32
    %c0_i32_0 = arith.constant 0 : i32
    return %c0_i32, %arg1 : i32, i32
  }
  func.func @transform_2(%arg0: i32, %arg1: i32) -> (i32, i32) {
    %c0_i32 = arith.constant 0 : i32
    %c0_i32_0 = arith.constant 0 : i32
    %c0_i32_1 = arith.constant 0 : i32
    return %c0_i32, %c0_i32_0 : i32, i32
  }
  func.func @transform_3(%arg0: i32, %arg1: i32) -> (i32, i32) {
    %c0_i32 = arith.constant 0 : i32
    %c0_i32_0 = arith.constant 0 : i32
    %c0_i32_1 = arith.constant 0 : i32
    return %c0_i32, %c0_i32_0 : i32, i32
  }
  func.func @transform_4(%arg0: i32, %arg1: i32) -> (i32, i32, i32) {
    %c0_i32 = arith.constant 0 : i32
    %c0_i32_0 = arith.constant 0 : i32
    return %arg0, %c0_i32, %arg1 : i32, i32, i32
  }
}

</mosaic_0001>

<bundles_post_ra>
// kernel: tpu_custom_call.1
= control target key start
LH: loop header
LB: loop body
LE: loop exit
PB: predicated region body
PF: predicated region fallthrough
CT: control target
= control target key end

     0   :  { %s972_s0 = inlined_call_operand.hbm [shape: bf16[2,16,16], index: 0, kind: input, shape index: {}]   ;;  %s973_s1 = inlined_call_operand.hbm [shape: bf16[16,256], index: 1, kind: input, shape index: {}]   ;;  %s974_s2 = inlined_call_operand.vmem [shape: bf16[8,16], index: 2, kind: input, shape index: {}]   ;;  %s975_s3 = inlined_call_operand.vmem [shape: f32[8,1], index: 3, kind: input, shape index: {}]   ;;  %s976_s4 = inlined_call_operand.hbm [shape: f32[2,8,256], index: 4, kind: output, shape index: {}]  }
   0x1   :  { %978 = sst [smem:[#allocation12_spill]] %s973_s1 }
   0x2   :  { %9 = vsyncpa [#allocation4], 0 }
   0x3   :  { %11 = vsyncpa [#allocation4 + $0x1], 0 }
   0x4   :  { %12 = vsyncpa [#allocation7], 0 }
   0x5   :  { %13 = vsyncpa [#allocation5], 0 }
   0x6   :  { %15 = vsyncpa [#allocation5 + $0x1], 0  ;;  %s784_s15 = smov 0   ;;  %s786_s16 = smov 0  }
   0x7   :  { %s788_s17 = smov 0   ;;  %s790_s18 = smov 0  }
   0x8   :  { %s792_s19 = smov 0   ;;  %s794_s20 = smov 0  }
   0x9 LB: > { %s492_s21 = sadd.s32 4294967295, %s747_s20   ;;  %s493_s22 = sadd.s32 4294967294, %s747_s20   ;;  %s747_s20 = sphi %s794_s20, %s21_s20   ;;  %s743_s19 = sphi %s792_s19, %s996_s19   ;;  %s739_s18 = sphi %s790_s18, %s995_s18   ;;  %s735_s17 = sphi %s788_s17, %s994_s17   ;;  %s731_s16 = sphi %s786_s16, %s993_s16   ;;  %s727_s15 = sphi %s784_s15, %s992_s15  }
   0xa   : > { %p53_p0 = scmp.ne.s32.totalorder %s731_s16, %s727_s15  ;;  %p818_p1 = scmp.eq.s32.totalorder %s492_s21, 0 }
   0xb   : > { %p822_p2 = scmp.eq.s32.totalorder %s492_s21, 1  ;;  %p153_p3 = scmp.eq.s32.totalorder %s493_s22, 1 }
   0xc   : > { %p828_p4 = por %p818_p1, %p53_p0  ;;  %p494_p5 = scmp.ge.s32.totalorder %s747_s20, 1 }
   0xd   : > { %p833_p6 = por %p153_p3, %p53_p0  ;;  %p160_p7 = scmp.lt.s32.totalorder %s747_s20, 3 }
   0xe   : > { %s981_s25 = scalar_select %p828_p4, 1, 0 }
   0xf   : > { %s982_s26 = scalar_select %p833_p6, 1, 0 }
  0x10   : > { %p838_p8 = pnand %p494_p5, %p160_p7  ;;  %s749_s28 = smov [#allocation6]  }
  0x11   : > { %s175_s29 = sshll.u32 %s749_s28, 4  ;;  %s33_s5 = sadd.s32 1, %s743_s19  ;;  %s176_s29 = int_to_ptr.vmem [resolvable:$true] %s175_s29 }
  0x12   : > { %p532_p9 = pneg %p838_p8  ;;  %s620_s6 = scalar_lea.vmem %s176_s29, 256 }
  0x13   : > { %p621_p13 = scmp.ne.s32.totalorder %s176_s29, %s620_s6  ;;  %p628_p5 = scmp.lt.s32.totalorder %s176_s29, %s176_s29 }
  0x14   : > { %p847_p11 = pnand %p532_p9, %p818_p1  ;;  %p629_p7 = scmp.lt.s32.totalorder %s620_s6, %s620_s6 }
  0x16   : > { %p611_p12 = pneg %p847_p11  ;;  %p630_p6 = por %p629_p7, %p628_p5 }
  0x18   : > { %p623_p0 = pnand %p621_p13, %p611_p12 }
  0x1a   : > { %p624_p3 = pneg %p623_p0 }
  0x1c   : > { %p631_p4 = pnand %p630_p6, %p624_p3 }
  0x1e   : > { %634 = shalt.err (!%p631_p4)
}
  0x1f   : > { %s750_s7 = smov 128   ;;  %s751_s8 = smov 8  }
  0x20   : > { %s985_s1 = sld [smem:[#allocation12_spill]]  ;;  %p35_p6 = scmp.ge.s32.totalorder %s33_s5, 2 }
  0x21   : > { %s40_s11 = sadd.s32 1, %s735_s17  ;;  %p47_p4 = scmp.ne.s32.totalorder %s735_s17, %s731_s16 }
  0x22   : > { %p48_p9 = scmp.eq.s32.totalorder %s747_s20, 0  ;;  %s998_s5 = smov (%p35_p6, %s33_s5), 0 }
  0x23   : > { %p871_p13 = por %p822_p2, %p47_p4  ;;  %s37_s14 = ssub.s32 %s743_s19, %s998_s5 }
  0x24   : > { %p865_p12 = por %p48_p9, %p47_p4  ;;  %p545_p0 = scmp.lt.s32.totalorder %s747_s20, 2 }
  0x25   : > { %s195_s21 = sand.u32 1, %s735_s17  }
  0x26   : > { %535 = dma.hbm_to_vmem [thread:$0]  (!%p847_p11), %s985_s1, 256, %s176_s29, [#allocation7], %s750_s7, %s750_s7, %s751_s8  }
  0x27   : > { %p38_p11 = scmp.eq.s32.totalorder %s37_s14, 0  ;;  %s497_s22 = sshll.u32 %s195_s21, 3 }
  0x28   : > { %s514_s29 = sshll.u32 %s743_s19, 7  ;;  %s199_s8 = scalar_lea.vmem [#allocation3], %s497_s22 }
  0x29   : > { %s880_s28 = scalar_select %p38_p11, %s735_s17, %s40_s11  }
  0x2a   : > { %s205_s7 = scalar_lea.hbm %s972_s0, %s514_s29  ;;  %s206_s9 = sshll.u32 %s199_s8, 4  ;;  %s207_s9 = int_to_ptr.vmem [resolvable:$true] %s206_s9 }
  0x2b   : > { %p888_p2 = pnand %p545_p0, %p865_p12  ;;  %s196_s10 = scalar_lea.sflag [#allocation4], %s195_s21 }
  0x2c   : > { %s648_s14 = scalar_lea.vmem %s207_s9, 128  ;;  %s752_s11 = smov [#allocation3]  }
  0x2d   : > { %p637_p3 = pneg %p888_p2  ;;  %p649_p5 = scmp.ne.s32.totalorder %s207_s9, %s648_s14 }
  0x2e   : > { %s653_s1 = sshll.u32 %s752_s11, 4  ;;  %s654_s1 = int_to_ptr.vmem [resolvable:$false] %s653_s1 }
  0x2f   : > { %p651_p7 = pnand %p649_p5, %p637_p3  ;;  %s655_s29 = scalar_lea.vmem %s654_s1, 256 }
  0x30   : > { %p656_p4 = scmp.lt.s32.totalorder %s207_s9, %s654_s1  ;;  %p657_p9 = scmp.lt.s32.totalorder %s655_s29, %s648_s14 }
  0x31   : > { %p652_p6 = pneg %p651_p7 }
  0x32   : > { %p658_p11 = por %p657_p9, %p656_p4 }
  0x34   : > { %p659_p10 = pnand %p658_p11, %p652_p6 }
  0x36   : > { %662 = shalt.err (!%p659_p10)
}
  0x37   : > { %s753_s12 = smov 64   ;;  %s754_s22 = smov 4  }
  0x38   : > { %539 = dma.hbm_to_vmem [thread:$0]  (!%p888_p2), %s205_s7, 128, %s207_s9, %s196_s10, %s753_s12, %s753_s12, %s754_s22  }
  0x39   : > { %218 = sbr.rel (%p838_p8) target bundleno = 484 (0x1e4), region = 36  ;;  %s899_s21 = sand.u32 (!%p838_p8), 1, %s731_s16  }
  0x3a   : > { %s501_s30 = sshll.u32 (!%p838_p8), %s899_s21, 3  ;;  %s221_s1 = scalar_lea.sflag (!%p838_p8), [#allocation4], %s899_s21 }
  0x3b   : > { %s224_s6 = scalar_lea.vmem (!%p838_p8), [#allocation3], %s501_s30  ;;  %p989_p12 = scmp.ne.s32.totalorder (!%p838_p8), %s981_s25, 0 }
  0x3e   : > { %714 = dma.done.wait (%p989_p12), %s221_s1, 128  }
  0x3f   : > { %716 = vsyncadd (%p989_p12), %s221_s1, 4294967168 }
  0x40   : > { %718 = dma.done.wait (%p818_p1), [#allocation7], 256  }
  0x41   : > { %720 = vsyncadd (%p818_p1), [#allocation7], 4294967040  ;;  %v755_v0 = vmov 0.0   ;;  %vm756_vm0 = vmmov 0   ;;  %v605_v1 = vld [vmem:[%s224_s6] sm:$0xff]   ;;  %vm269_vm1 = vcmask 130048  }
  0x42   : > { %518 = vmatprep.subr.bf16.mxu0 %v755_v0  ;;  %520 = vmatprep.mubr.msk.bf16.mxu0 %vm756_vm0, %v755_v0  ;;  %v260_v2 = vld [vmem:[%s974_s2] sm:$0xf]  ;;  %v608_v4 = vld [vmem:[#allocation6] ss:$8 sps:$4 sm:$0xff]   ;;  %v757_v5 = vmov 0   ;;  %vm314_vm2 = vcmask 125952  }
  0x43   : > { %519 = vmatpush3.bf16.msra.mxu0 %v605_v1  ;;  %v606_v3 = vld [vmem:[#allocation6 + $0x4] ss:$8 sps:$4 sm:$0xff]   ;;  %371 = vmatprep.mubr.bf16.mxu1 %v757_v5  ;;  %s503_s8 = sshll.u32 %s899_s21, 4  ;;  %s515_s9 = sshll.u32 %s739_s18, 8 }
  0x44   : > { %353 = vmatprep.subr.bf16.mxu1 %v606_v3  ;;  %604 = vset.pattern.permute.xlu0 %v757_v5  ;;  %v319_v6 = vld [vmem:[%s975_s3] sm:$0xff]  ;;  %s252_s24 = scalar_lea.vmem [#allocation8], %s503_s8  ;;  %s924_s29 = scalar_lea.hbm %s976_s4, %s515_s9 }
  0x45   : > { %354 = vmatpush1.bf16.msra.mxu1 %v608_v4  ;;  %322 = vperm.xlu0 %604, %v319_v6   ;;  %s399_s10 = sshll.u32 %s252_s24, 4  ;;  %s383_s18 = scalar_lea.sflag [#allocation5], %s899_s21  ;;  %s926_s10 = int_to_ptr.vmem [resolvable:$true] %s399_s10 }
  0x46   : > { %521 = vmatmul.mubr.msk.bf16.vlgmr.msra.gmra.mxu0 %vm269_vm1, %v260_v2  ;;  %s663_s12 = scalar_lea.vmem %s926_s10, 256  ;;  %s758_s22 = smov [#allocation8]  }
  0x47   : > { %p664_p1 = scmp.ne.s32.totalorder %s926_s10, %s663_s12  ;;  %s667_s30 = sshll.u32 %s758_s22, 4  ;;  %s668_s30 = int_to_ptr.vmem [resolvable:$false] %s667_s30 }
  0x48   : > { %s669_s1 = scalar_lea.vmem %s668_s30, 512  ;;  %p670_p0 = scmp.lt.s32.totalorder %s926_s10, %s668_s30 }
  0x49   : > { %p665_p8 = pnand %p664_p1, %p871_p13  ;;  %p671_p2 = scmp.lt.s32.totalorder %s669_s1, %s663_s12 }
  0x4b   : > { %p666_p10 = pneg %p665_p8  ;;  %p672_p3 = por %p671_p2, %p670_p0 }
  0x4d   : > { %p673_p5 = pnand %p672_p3, %p666_p10 }
  0xc0   : > { %v323_v13 = vpop.permute.xlu0 %322 }
 0x106   : > { %v307_v7 = vpop.f32.mrf.mxu0 }
 0x107   : > { %v313_v8 = vpack.c.bf16 %v307_v7, %v307_v7 }
 0x108   : > { %v522_v9 = vpop.f32.mrf.mxu0 }
 0x109   : > { %315 = vst.msk [vmem:[#allocation2] sm:$0xf] %vm314_vm2, %v313_v8 }
 0x10a   : > { %v310_v10 = vpop.f32.mrf.mxu0 }
 0x10c   : > { %v523_v11 = vpop.f32.mrf.mxu0 }
 0x110   : > { %v316_v12 = vld [vmem:[#allocation2] sm:$0xf] }
 0x111   : > { %508 = vmatmul.mubr.msk.bf16.vlgmr.msra.gmra.mxu1 %vm269_vm1, %v316_v12 }
 0x1d1   : > { %v373_v14 = vpop.f32.mrf.mxu1 }
 0x1d2   : > { %v374_v15 = vadd.f32 %v373_v14, %v323_v13 }
 0x1d3   : > { %v375_v16 = vpop.f32.mrf.mxu1 }
 0x1d4   : > { %380 = vst [vmem:[%s252_s24] sm:$0xff] %v374_v15  ;;  %v376_v17 = vadd.f32 %v375_v16, %v323_v13 }
 0x1d5   : > { %v377_v18 = vpop.f32.mrf.mxu1 }
 0x1d6   : > { %381 = vst [vmem:[%s252_s24 + $0x8] sm:$0xff] %v376_v17 }
 0x1d7   : > { %v378_v19 = vpop.f32.mrf.mxu1 }
 0x1d8   : > { %676 = shalt.err (!%p673_p5)
}
 0x1d9   : > { %s677_s6 = scalar_lea.hbm %s924_s29, 256  ;;  %s681_s7 = scalar_lea.hbm %s976_s4, 512 }
 0x1da   : > { %p678_p7 = scmp.ne.s32.totalorder %s924_s29, %s677_s6  ;;  %p682_p9 = scmp.lt.s32.totalorder %s924_s29, %s976_s4 }
 0x1db   : > { %p683_p11 = scmp.lt.s32.totalorder %s681_s7, %s677_s6 }
 0x1dc   : > { %p679_p6 = pnand %p678_p7, %p871_p13 }
 0x1dd   : > { %p684_p12 = por %p683_p11, %p682_p9 }
 0x1de   : > { %p680_p4 = pneg %p679_p6 }
 0x1e0   : > { %p685_p1 = pnand %p684_p12, %p680_p4 }
 0x1e2   : > { %688 = shalt.err (!%p685_p1)
}
 0x1e3   : > { %530 = dma.vmem_to_hbm [thread:$0]  (%p871_p13), %s926_s10, 256, %s924_s29, %s383_s18  }
 0x1e4 PF: > { %s411_s8 = sand.u32 1, %s727_s15   ;;  %p990_p8 = scmp.ne.s32.totalorder %s982_s26, 0 }
 0x1e5   : > { %p991_p10 = scmp.ge.s32.totalorder %s747_s20, 2  ;;  %s412_s9 = scalar_lea.sflag [#allocation5], %s411_s8 }
 0x1e7   : > { %p541_p0 = pnand %p991_p10, %p990_p8 }
 0x1e9   : > { %p542_p2 = pneg %p541_p0 }
 0x1eb   : > { %722 = dma.done.wait (%p542_p2), %s412_s9, 256  }
 0x1ec   : > { %724 = vsyncadd (%p542_p2), %s412_s9, 4294967040  ;;  %s21_s20 = sadd.s32 1, %s747_s20   ;;  %s992_s15 = smov %s731_s16 }
 0x1ed   : > { %p18_p3 = scmp.ge.s32.totalorder %s21_s20, 4   ;;  %s993_s16 = smov %s735_s17 }
 0x1ee   : > { %s994_s17 = smov %s880_s28  ;;  %s995_s18 = smov %s743_s19 }
 0x1ef   : > { %s996_s19 = smov %s998_s5  ;;  %20 = sbr.rel (!%p18_p3) target bundleno = 9 (0x9), region = 90 }
 0x1f4   :  { %417 = vsyncpa [#allocation4], 1 }
 0x1f5   :  { %419 = vsyncpa [#allocation4 + $0x1], 1 }
 0x1f6   :  { %420 = vsyncpa [#allocation7], 1 }
 0x1f7   :  { %421 = vsyncpa [#allocation5], 1 }
 0x1f8   :  { %423 = vsyncpa [#allocation5 + $0x1], 1 }

</bundles_post_ra>
